<compile_context>
chip_gen: v6e
topology: v6e:2x2x1
jax: 0.10.0
libtpu: 0.0.40
codegen_flags: <defaults>
</compile_context>

<pallas_src>
import jax
import jax.numpy as jnp
from jax.experimental import pallas as pl
from jax.experimental.pallas import tpu as pltpu


def _round_up(x, m):
    return ((x + m - 1) // m) * m


def _pick_spatial_tile(hw, cp, vmem_budget_bytes=8 << 20):
    """Largest multiple-of-128 divisor of hw whose double-buffered bf16-in +
    f32-out tiles fit the budget; falls back to the full extent."""
    cap = max(128, vmem_budget_bytes // (cp * (2 + 4) * 2))
    best = None
    t = 128
    while t <= hw:
        if hw % t == 0 and t <= cap:
            best = t
        t += 128
    return best if best is not None else hw


def conv3x3_stats_kernel(xp_ref, w_ref, y_ref, sum_ref, ssq_ref):
    """3x3 conv as a single im2col MXU matmul, plus per-channel BN stats.

    xp_ref : (1, Cin, Hp, Wp)  reflection-padded input (bf16, NCHW native)
    w_ref  : (Cp, 9*Cin)       conv weights, (kh,kw,ci)-major (bf16)
    y_ref  : (1, Cp, H*W)      conv output (bf16, spatial on lanes)
    sum_ref: (1, Cp, 1)        per-channel sum for this batch element (f32)
    ssq_ref: (1, Cp, 1)        per-channel sum of squares (f32)
    """
    _, cin, hp, wp = xp_ref.shape
    h, w = hp - 2, wp - 2

    x = xp_ref[0]                                              # (Cin, Hp, Wp) bf16
    # im2col (transposed): 9 shifted views stacked on the K axis -> K = 9*Cin.
    taps = [x[:, kh:kh + h, kw:kw + w]
            for kh in range(3) for kw in range(3)]             # 9 x (Cin, H, W)
    patch_t = jnp.concatenate(taps, axis=0).reshape(9 * cin, h * w)   # bf16

    acc = jax.lax.dot_general(                                 # single fat matmul
        w_ref[...], patch_t,
        dimension_numbers=(((1,), (0,)), ((), ())),
        preferred_element_type=jnp.float32)                    # (Cp, H*W) f32

    y_ref[0] = acc.astype(y_ref.dtype)                         # bf16 store
    # BN batch statistics while the f32 accumulator is still live in VMEM
    # (cross-lane XLU reduces ride a free slot of this DMA/MXU-bound pass).
    sum_ref[0] = jnp.sum(acc, axis=1, keepdims=True)           # (Cp, 1)
    ssq_ref[0] = jnp.sum(acc * acc, axis=1, keepdims=True)     # (Cp, 1)


def bn_relu_kernel(y_ref, scale_ref, shift_ref, o_ref):
    """Folded-BN affine + ReLU on a (Cp, tile) slab; output is NCHW-native."""
    y = y_ref[0].astype(jnp.float32)                           # (Cp, t)
    o_ref[0] = jnp.maximum(y * scale_ref[0] + shift_ref[0], 0.0)


def conv_layer_forward(x_nchw, w, b, gamma, beta):
    """x_nchw: (N, Cin, H, W) f32 -> (N, Cout, H, W) f32."""
    # The conv bias is mathematically cancelled by training-mode BatchNorm
    # (the batch mean absorbs it), so it is not fed to the kernels.
    del b
    N, Cin, H, W = x_nchw.shape
    Cout = w.shape[0]
    d = 1                        # dilation / reflection-pad amount
    eps = 1e-5
    HW = H * W
    Cp = _round_up(Cout, 8)      # sublane-multiple channel padding only

    # --- glue: reflection pad (stays NCHW) + weight repack, bf16 operands ---
    xp = jnp.pad(x_nchw, ((0, 0), (0, 0), (d, d), (d, d)), mode="reflect")
    xp = xp.astype(jnp.bfloat16)
    Hp, Wp = H + 2 * d, W + 2 * d

    w_mat = jnp.transpose(w, (0, 2, 3, 1)).reshape(Cout, 9 * Cin)   # (kh,kw,ci)
    w_mat = jnp.pad(w_mat, ((0, Cp - Cout), (0, 0))).astype(jnp.bfloat16)

    # --- pass 1: conv + per-batch-element BN partial stats (grid over batch) ---
    conv_out, sums, sqsums = pl.pallas_call(
        conv3x3_stats_kernel,
        out_shape=(
            jax.ShapeDtypeStruct((N, Cp, HW), jnp.bfloat16),
            jax.ShapeDtypeStruct((N, Cp, 1), jnp.float32),
            jax.ShapeDtypeStruct((N, Cp, 1), jnp.float32),
        ),
        grid=(N,),
        in_specs=[
            pl.BlockSpec((1, Cin, Hp, Wp), lambda n: (n, 0, 0, 0)),
            pl.BlockSpec((Cp, 9 * Cin), lambda n: (0, 0)),
        ],
        out_specs=(
            pl.BlockSpec((1, Cp, HW), lambda n: (n, 0, 0)),
            pl.BlockSpec((1, Cp, 1), lambda n: (n, 0, 0)),
            pl.BlockSpec((1, Cp, 1), lambda n: (n, 0, 0)),
        ),
        compiler_params=pltpu.CompilerParams(dimension_semantics=("parallel",)),
    )(xp, w_mat)

    # --- fold batch statistics into a per-channel affine (tiny O(C) math) ---
    # NOTE: E[x^2]-E[x]^2 in f32; fine at these sizes, use Welford for huge H*W.
    n_elems = float(N * HW)
    mean = jnp.sum(sums[:, :, 0], axis=0) / n_elems            # (Cp,)
    ex2 = jnp.sum(sqsums[:, :, 0], axis=0) / n_elems
    var = jnp.maximum(ex2 - mean * mean, 0.0)
    rstd = jax.lax.rsqrt(var + eps)
    g = jnp.pad(gamma, (0, Cp - Cout)) * rstd
    scale = g.reshape(1, Cp, 1).astype(jnp.float32)
    shift = (jnp.pad(beta, (0, Cp - Cout)) - mean * g).reshape(1, Cp, 1)
    shift = shift.astype(jnp.float32)

    # --- pass 2: normalize + ReLU, gridded (batch, spatial tiles), lane-dense ---
    t = _pick_spatial_tile(HW, Cp)
    out = pl.pallas_call(
        bn_relu_kernel,
        out_shape=jax.ShapeDtypeStruct((N, Cp, HW), jnp.float32),
        grid=(N, HW // t),
        in_specs=[
            pl.BlockSpec((1, Cp, t), lambda n, m: (n, 0, m)),
            pl.BlockSpec((1, Cp, 1), lambda n, m: (0, 0, 0)),
            pl.BlockSpec((1, Cp, 1), lambda n, m: (0, 0, 0)),
        ],
        out_specs=pl.BlockSpec((1, Cp, t), lambda n, m: (n, 0, m)),
        compiler_params=pltpu.CompilerParams(
            dimension_semantics=("parallel", "parallel")),
    )(conv_out, scale, shift)

    # (N, Cp, HW) is already channel-major: the reshape is layout-free and the
    # channel slice is a no-op when Cout is a multiple of 8 (as here).
    return out[:, :Cout, :].reshape(N, Cout, H, W)


def reference(x_nchw, w, b, gamma, beta):
    eps = 1e-5
    xp = jnp.pad(x_nchw, ((0, 0), (0, 0), (1, 1), (1, 1)), mode="reflect")
    y = jax.lax.conv_general_dilated(
        xp, w, window_strides=(1, 1), padding="VALID",
        dimension_numbers=("NCHW", "OIHW", "NCHW"))
    y = y + b[None, :, None, None]
    mean = jnp.mean(y, axis=(0, 2, 3), keepdims=True)
    var = jnp.mean((y - mean) ** 2, axis=(0, 2, 3), keepdims=True)
    yn = (y - mean) / jnp.sqrt(var + eps)
    yn = yn * gamma[None, :, None, None] + beta[None, :, None, None]
    return jnp.maximum(yn, 0.0)


if __name__ == "__main__":
    N, Cin, Cout, H, W = 2, 4, 8, 16, 16

    key = jax.random.PRNGKey(0)
    kx, kw_, kb = jax.random.split(key, 3)
    x = jax.random.normal(kx, (N, Cin, H, W), dtype=jnp.float32)
    w = 0.1 * jax.random.normal(kw_, (Cout, Cin, 3, 3), dtype=jnp.float32)
    b = 0.1 * jax.random.normal(kb, (Cout,), dtype=jnp.float32)
    gamma = jnp.ones((Cout,), jnp.float32)   # PyTorch BatchNorm2d default
    beta = jnp.zeros((Cout,), jnp.float32)

    out = jax.jit(conv_layer_forward)(x, w, b, gamma, beta)
    out = jax.block_until_ready(out)

    ref = reference(x, w, b, gamma, beta)
    assert out.shape == (N, Cout, H, W)
    # bf16 matmul operands + bf16 conv_out storage vs. the f32 reference conv:
    # intentional precision trade, covered by the tolerance below.
    assert jnp.allclose(out, ref, atol=1e-2, rtol=1e-2), \
        float(jnp.max(jnp.abs(out - ref)))

    print("KERNEL_OK")
</pallas_src>

<mosaic_0001>
module attributes {stable_mosaic.version = 11 : i64} {
  func.func @conv3x3_stats_kernel(%arg0: i32, %arg1: memref<1x4x18x18xbf16, #tpu.memory_space<vmem>>, %arg2: memref<8x36xbf16, #tpu.memory_space<vmem>>, %arg3: memref<1x8x256xbf16, #tpu.memory_space<vmem>>, %arg4: memref<1x8x1xf32, #tpu.memory_space<vmem>>, %arg5: memref<1x8x1xf32, #tpu.memory_space<vmem>>) attributes {dimension_semantics = [#tpu.dimension_semantics<parallel>], iteration_bounds = array<i64: 2>, scalar_prefetch = 0 : i64, scratch_operands = 0 : i64, tpu.core_type = #tpu.core_type<tc>, window_params = [{transform_indices = @transform_0, window_bounds = array<i64: 1, 4, 18, 18>}, {pipeline_mode = #tpu.pipeline_mode<synchronous>, transform_indices = @transform_1, window_bounds = array<i64: 8, 36>}, {transform_indices = @transform_2, window_bounds = array<i64: 1, 8, 256>}, {transform_indices = @transform_3, window_bounds = array<i64: 1, 8, 1>}, {transform_indices = @transform_4, window_bounds = array<i64: 1, 8, 1>}]} {
    %c0 = arith.constant 0 : index
    %c0_0 = arith.constant 0 : index
    %c0_1 = arith.constant 0 : index
    %c0_2 = arith.constant 0 : index
    %0 = vector.load %arg1[%c0, %c0_0, %c0_1, %c0_2] : memref<1x4x18x18xbf16, #tpu.memory_space<vmem>>, vector<1x4x18x18xbf16>
    %1 = vector.shape_cast %0 : vector<1x4x18x18xbf16> to vector<4x18x18xbf16>
    %2 = vector.extract_strided_slice %1 {offsets = [0, 0, 0], sizes = [4, 16, 16], strides = [1, 1, 1]} : vector<4x18x18xbf16> to vector<4x16x16xbf16>
    %3 = vector.extract_strided_slice %1 {offsets = [0, 0, 1], sizes = [4, 16, 16], strides = [1, 1, 1]} : vector<4x18x18xbf16> to vector<4x16x16xbf16>
    %4 = vector.extract_strided_slice %1 {offsets = [0, 0, 2], sizes = [4, 16, 16], strides = [1, 1, 1]} : vector<4x18x18xbf16> to vector<4x16x16xbf16>
    %5 = vector.extract_strided_slice %1 {offsets = [0, 1, 0], sizes = [4, 16, 16], strides = [1, 1, 1]} : vector<4x18x18xbf16> to vector<4x16x16xbf16>
    %6 = vector.extract_strided_slice %1 {offsets = [0, 1, 1], sizes = [4, 16, 16], strides = [1, 1, 1]} : vector<4x18x18xbf16> to vector<4x16x16xbf16>
    %7 = vector.extract_strided_slice %1 {offsets = [0, 1, 2], sizes = [4, 16, 16], strides = [1, 1, 1]} : vector<4x18x18xbf16> to vector<4x16x16xbf16>
    %8 = vector.extract_strided_slice %1 {offsets = [0, 2, 0], sizes = [4, 16, 16], strides = [1, 1, 1]} : vector<4x18x18xbf16> to vector<4x16x16xbf16>
    %9 = vector.extract_strided_slice %1 {offsets = [0, 2, 1], sizes = [4, 16, 16], strides = [1, 1, 1]} : vector<4x18x18xbf16> to vector<4x16x16xbf16>
    %10 = vector.extract_strided_slice %1 {offsets = [0, 2, 2], sizes = [4, 16, 16], strides = [1, 1, 1]} : vector<4x18x18xbf16> to vector<4x16x16xbf16>
    %11 = tpu.concatenate %2, %3, %4, %5, %6, %7, %8, %9, %10 in 0 : vector<4x16x16xbf16>, vector<4x16x16xbf16>, vector<4x16x16xbf16>, vector<4x16x16xbf16>, vector<4x16x16xbf16>, vector<4x16x16xbf16>, vector<4x16x16xbf16>, vector<4x16x16xbf16>, vector<4x16x16xbf16> -> vector<36x16x16xbf16>
    %12 = vector.shape_cast %11 : vector<36x16x16xbf16> to vector<36x256xbf16>
    %c0_3 = arith.constant 0 : index
    %c0_4 = arith.constant 0 : index
    %13 = vector.load %arg2[%c0_3, %c0_4] : memref<8x36xbf16, #tpu.memory_space<vmem>>, vector<8x36xbf16>
    %cst = arith.constant dense<0.000000e+00> : vector<8x256xf32>
    %14 = tpu.matmul %13, %12, %cst {dimension_numbers = #tpu.dot_dimension_numbers<[1], [0], [0], [1], [0, 0, 1, 1], [], []>} : vector<8x36xbf16>, vector<36x256xbf16>, vector<8x256xf32> -> vector<8x256xf32>
    %15 = arith.truncf %14 : vector<8x256xf32> to vector<8x256xbf16>
    %c0_5 = arith.constant 0 : index
    %c0_6 = arith.constant 0 : index
    %c0_7 = arith.constant 0 : index
    %16 = vector.load %arg3[%c0_5, %c0_6, %c0_7] : memref<1x8x256xbf16, #tpu.memory_space<vmem>>, vector<1x8x256xbf16>
    %17 = vector.shape_cast %16 : vector<1x8x256xbf16> to vector<8x256xbf16>
    %18 = vector.shape_cast %15 : vector<8x256xbf16> to vector<1x8x256xbf16>
    tpu.vector_store %arg3[%c0_5, %c0_6, %c0_7], %18 {strides = array<i32>} : memref<1x8x256xbf16, #tpu.memory_space<vmem>>, vector<1x8x256xbf16>,
    %cst_8 = arith.constant dense<0.000000e+00> : vector<8xf32>
    %19 = vector.multi_reduction <add>, %14, %cst_8 [1] : vector<8x256xf32> to vector<8xf32>
    %20 = vector.shape_cast %19 : vector<8xf32> to vector<8x1xf32>
    %c0_9 = arith.constant 0 : index
    %c0_10 = arith.constant 0 : index
    %c0_11 = arith.constant 0 : index
    %21 = vector.load %arg4[%c0_9, %c0_10, %c0_11] : memref<1x8x1xf32, #tpu.memory_space<vmem>>, vector<1x8x1xf32>
    %22 = vector.shape_cast %21 : vector<1x8x1xf32> to vector<8x1xf32>
    %23 = vector.shape_cast %20 : vector<8x1xf32> to vector<1x8x1xf32>
    tpu.vector_store %arg4[%c0_9, %c0_10, %c0_11], %23 {strides = array<i32>} : memref<1x8x1xf32, #tpu.memory_space<vmem>>, vector<1x8x1xf32>,
    %24 = arith.mulf %14, %14 : vector<8x256xf32>
    %cst_12 = arith.constant dense<0.000000e+00> : vector<8xf32>
    %25 = vector.multi_reduction <add>, %24, %cst_12 [1] : vector<8x256xf32> to vector<8xf32>
    %26 = vector.shape_cast %25 : vector<8xf32> to vector<8x1xf32>
    %c0_13 = arith.constant 0 : index
    %c0_14 = arith.constant 0 : index
    %c0_15 = arith.constant 0 : index
    %27 = vector.load %arg5[%c0_13, %c0_14, %c0_15] : memref<1x8x1xf32, #tpu.memory_space<vmem>>, vector<1x8x1xf32>
    %28 = vector.shape_cast %27 : vector<1x8x1xf32> to vector<8x1xf32>
    %29 = vector.shape_cast %26 : vector<8x1xf32> to vector<1x8x1xf32>
    tpu.vector_store %arg5[%c0_13, %c0_14, %c0_15], %29 {strides = array<i32>} : memref<1x8x1xf32, #tpu.memory_space<vmem>>, vector<1x8x1xf32>,
    return
  }
  func.func @transform_0(%arg0: i32) -> (i32, i32, i32, i32) {
    %c0_i32 = arith.constant 0 : i32
    %c0_i32_0 = arith.constant 0 : i32
    %c0_i32_1 = arith.constant 0 : i32
    %c0_i32_2 = arith.constant 0 : i32
    return %arg0, %c0_i32, %c0_i32_0, %c0_i32_1 : i32, i32, i32, i32
  }
  func.func @transform_1(%arg0: i32) -> (i32, i32) {
    %c0_i32 = arith.constant 0 : i32
    %c0_i32_0 = arith.constant 0 : i32
    %c0_i32_1 = arith.constant 0 : i32
    return %c0_i32, %c0_i32_0 : i32, i32
  }
  func.func @transform_2(%arg0: i32) -> (i32, i32, i32) {
    %c0_i32 = arith.constant 0 : i32
    %c0_i32_0 = arith.constant 0 : i32
    %c0_i32_1 = arith.constant 0 : i32
    return %arg0, %c0_i32, %c0_i32_0 : i32, i32, i32
  }
  func.func @transform_3(%arg0: i32) -> (i32, i32, i32) {
    %c0_i32 = arith.constant 0 : i32
    %c0_i32_0 = arith.constant 0 : i32
    %c0_i32_1 = arith.constant 0 : i32
    return %arg0, %c0_i32, %c0_i32_0 : i32, i32, i32
  }
  func.func @transform_4(%arg0: i32) -> (i32, i32, i32) {
    %c0_i32 = arith.constant 0 : i32
    %c0_i32_0 = arith.constant 0 : i32
    %c0_i32_1 = arith.constant 0 : i32
    return %arg0, %c0_i32, %c0_i32_0 : i32, i32, i32
  }
}

module attributes {stable_mosaic.version = 11 : i64} {
  func.func @bn_relu_kernel(%arg0: i32, %arg1: i32, %arg2: memref<1x8x256xbf16, #tpu.memory_space<vmem>>, %arg3: memref<1x8x1xf32, #tpu.memory_space<vmem>>, %arg4: memref<1x8x1xf32, #tpu.memory_space<vmem>>, %arg5: memref<1x8x256xf32, #tpu.memory_space<vmem>>) attributes {dimension_semantics = [#tpu.dimension_semantics<parallel>, #tpu.dimension_semantics<parallel>], iteration_bounds = array<i64: 2, 1>, scalar_prefetch = 0 : i64, scratch_operands = 0 : i64, tpu.core_type = #tpu.core_type<tc>, window_params = [{transform_indices = @transform_0, window_bounds = array<i64: 1, 8, 256>}, {pipeline_mode = #tpu.pipeline_mode<synchronous>, transform_indices = @transform_1, window_bounds = array<i64: 1, 8, 1>}, {pipeline_mode = #tpu.pipeline_mode<synchronous>, transform_indices = @transform_2, window_bounds = array<i64: 1, 8, 1>}, {transform_indices = @transform_3, window_bounds = array<i64: 1, 8, 256>}]} {
    %c0 = arith.constant 0 : index
    %c0_0 = arith.constant 0 : index
    %c0_1 = arith.constant 0 : index
    %0 = vector.load %arg2[%c0, %c0_0, %c0_1] : memref<1x8x256xbf16, #tpu.memory_space<vmem>>, vector<1x8x256xbf16>
    %1 = vector.shape_cast %0 : vector<1x8x256xbf16> to vector<8x256xbf16>
    %2 = arith.extf %1 : vector<8x256xbf16> to vector<8x256xf32>
    %c0_2 = arith.constant 0 : index
    %c0_3 = arith.constant 0 : index
    %c0_4 = arith.constant 0 : index
    %3 = vector.load %arg3[%c0_2, %c0_3, %c0_4] : memref<1x8x1xf32, #tpu.memory_space<vmem>>, vector<1x8x1xf32>
    %4 = vector.shape_cast %3 : vector<1x8x1xf32> to vector<8x1xf32>
    %5 = vector.broadcast %4 : vector<8x1xf32> to vector<8x256xf32>
    %6 = arith.mulf %2, %5 : vector<8x256xf32>
    %c0_5 = arith.constant 0 : index
    %c0_6 = arith.constant 0 : index
    %c0_7 = arith.constant 0 : index
    %7 = vector.load %arg4[%c0_5, %c0_6, %c0_7] : memref<1x8x1xf32, #tpu.memory_space<vmem>>, vector<1x8x1xf32>
    %8 = vector.shape_cast %7 : vector<1x8x1xf32> to vector<8x1xf32>
    %9 = vector.broadcast %8 : vector<8x1xf32> to vector<8x256xf32>
    %10 = arith.addf %6, %9 : vector<8x256xf32>
    %cst = arith.constant 0.000000e+00 : f32
    %11 = vector.broadcast %cst : f32 to vector<8x256xf32>
    %12 = arith.maximumf %10, %11 : vector<8x256xf32>
    %c0_8 = arith.constant 0 : index
    %c0_9 = arith.constant 0 : index
    %c0_10 = arith.constant 0 : index
    %13 = vector.load %arg5[%c0_8, %c0_9, %c0_10] : memref<1x8x256xf32, #tpu.memory_space<vmem>>, vector<1x8x256xf32>
    %14 = vector.shape_cast %13 : vector<1x8x256xf32> to vector<8x256xf32>
    %15 = vector.shape_cast %12 : vector<8x256xf32> to vector<1x8x256xf32>
    tpu.vector_store %arg5[%c0_8, %c0_9, %c0_10], %15 {strides = array<i32>} : memref<1x8x256xf32, #tpu.memory_space<vmem>>, vector<1x8x256xf32>,
    return
  }
  func.func @transform_0(%arg0: i32, %arg1: i32) -> (i32, i32, i32) {
    %c0_i32 = arith.constant 0 : i32
    %c0_i32_0 = arith.constant 0 : i32
    return %arg0, %c0_i32, %arg1 : i32, i32, i32
  }
  func.func @transform_1(%arg0: i32, %arg1: i32) -> (i32, i32, i32) {
    %c0_i32 = arith.constant 0 : i32
    %c0_i32_0 = arith.constant 0 : i32
    %c0_i32_1 = arith.constant 0 : i32
    %c0_i32_2 = arith.constant 0 : i32
    return %c0_i32, %c0_i32_0, %c0_i32_1 : i32, i32, i32
  }
  func.func @transform_2(%arg0: i32, %arg1: i32) -> (i32, i32, i32) {
    %c0_i32 = arith.constant 0 : i32
    %c0_i32_0 = arith.constant 0 : i32
    %c0_i32_1 = arith.constant 0 : i32
    %c0_i32_2 = arith.constant 0 : i32
    return %c0_i32, %c0_i32_0, %c0_i32_1 : i32, i32, i32
  }
  func.func @transform_3(%arg0: i32, %arg1: i32) -> (i32, i32, i32) {
    %c0_i32 = arith.constant 0 : i32
    %c0_i32_0 = arith.constant 0 : i32
    return %arg0, %c0_i32, %arg1 : i32, i32, i32
  }
}

</mosaic_0001>

<bundles_post_ra>
// kernel: conv_layer_forward.3
= control target key start
LH: loop header
LB: loop body
LE: loop exit
PB: predicated region body
PF: predicated region fallthrough
CT: control target
= control target key end

     0   :  { %s404_s12 = smov 0   ;;  %s406_s13 = smov 0   ;;  %s443_s0 = inlined_call_operand.vmem [shape: bf16[2,8,256], index: 0, kind: input, shape index: {}]   ;;  %s444_s1 = inlined_call_operand.vmem [shape: f32[1,8,1], index: 1, kind: input, shape index: {}]   ;;  %s445_s2 = inlined_call_operand.vmem [shape: f32[1,8,1], index: 2, kind: input, shape index: {}]   ;;  %s446_s3 = inlined_call_operand.vmem [shape: f32[2,8,256], index: 3, kind: output, shape index: {}]  }
   0x1   :  { %s408_s14 = smov 0  }
   0x2 LB: > { %s25_s15 = sadd.s32 1, %s377_s13  ;;  %p324_p0 = scmp.ge.s32.totalorder %s381_s14, 1  ;;  %s381_s14 = sphi %s408_s14, %s13_s14   ;;  %s377_s13 = sphi %s406_s13, %s448_s13   ;;  %s373_s12 = sphi %s404_s12, %s447_s12  }
   0x3   : > { %p27_p1 = scmp.ge.s32.totalorder %s25_s15, 2  ;;  %p158_p2 = scmp.lt.s32.totalorder %s381_s14, 3 }
   0x5   : > { %s450_s15 = smov (%p27_p1, %s25_s15), 0  ;;  %p159_p3 = pnand %p324_p0, %p158_p2 }
   0x6   : > { %p191_p4 = scmp.lt.s32.totalorder (!%p159_p3), %s373_s12, 1 }
   0x7   : > { %162 = sbr.rel (%p159_p3) target bundleno = 147 (0x93), region = 32 }
   0xc   : > { %v213_v0 = vld [vmem:[%s444_s1] sm:$0xff]  ;;  %v383_v1 = vmov 0   ;;  %s452_s12 = smov (!%p191_p4, %s373_s12), 1 }
   0xd   : > { %358 = vset.pattern.permute.xlu0 %v383_v1  ;;  %v221_v2 = vld [vmem:[%s445_s2] sm:$0xff]  ;;  %s331_s20 = sshll.u32 %s452_s12, 3  ;;  %s332_s24 = sshll.u32 %s452_s12, 4 }
   0xe   : > { %216 = vperm.xlu0 %358, %v213_v0   ;;  %s198_s23 = scalar_lea.vmem %s443_s0, %s331_s20  ;;  %s208_s27 = scalar_lea.vmem %s446_s3, %s332_s24 }
   0xf   : > { %v210_v3 = vld [vmem:[%s198_s23] sm:$0xff] }
  0x10   : > { %v211_v4 = vunpack.c.l.bf16 %v210_v3  ;;  %v212_v5 = vunpack.c.h.bf16 %v210_v3 }
  0x12   : > { %224 = vperm.xlu0 %358, %v221_v2  }
  0x89   : > { %v217_v6 = vpop.permute.xlu0 %216 }
  0x8a   : > { %v219_v7 = vmul.f32 %v217_v6, %v211_v4  ;;  %v220_v8 = vmul.f32 %v217_v6, %v212_v5 }
  0x8d   : > { %v225_v9 = vpop.permute.xlu0 %224 }
  0x8e   : > { %v227_v10 = vadd.f32 %v225_v9, %v219_v7  ;;  %v228_v11 = vadd.f32 %v225_v9, %v220_v8 }
  0x90   : > { %v229_v12 = vmax.f32 %v227_v10, 0.0  ;;  %v230_v13 = vmax.f32 %v228_v11, 0.0 }
  0x92   : > { %231 = vst [vmem:[%s208_s27] sm:$0xff] %v229_v12  ;;  %232 = vst [vmem:[%s208_s27 + $0x8] sm:$0xff] %v230_v13 }
  0x93 PF: > { %s13_s14 = sadd.s32 1, %s381_s14   ;;  %s447_s12 = smov %s377_s13 }
  0x94   : > { %p10_p5 = scmp.ge.s32.totalorder %s13_s14, 4   ;;  %s448_s13 = smov %s450_s15 }
  0x96   :  { %12 = sbr.rel (!%p10_p5) target bundleno = 2 (0x2), region = 62 }

// kernel: conv_layer_forward.2
= control target key start
LH: loop header
LB: loop body
LE: loop exit
PB: predicated region body
PF: predicated region fallthrough
CT: control target
= control target key end

     0   :  { %s2154_s15 = smov 0   ;;  %s3019_s0 = inlined_call_operand.vmem [shape: bf16[2,4,18,18], index: 0, kind: input, shape index: {}]   ;;  %s3020_s1 = inlined_call_operand.vmem [shape: bf16[8,36], index: 1, kind: input, shape index: {}]   ;;  %s3021_s2 = inlined_call_operand.vmem [shape: bf16[2,8,256], index: 2, kind: output, shape index: {0}]   ;;  %s3022_s3 = inlined_call_operand.vmem [shape: f32[2,8,1], index: 3, kind: output, shape index: {1}]   ;;  %s3023_s4 = inlined_call_operand.vmem [shape: f32[2,8,1], index: 4, kind: output, shape index: {2}]  }
   0x1 LB: > { %s1995_s16 = sadd.s32 4294967295, %s2115_s15   ;;  %p1999_p0 = scmp.ge.s32.totalorder %s2115_s15, 1  ;;  %s2115_s15 = sphi %s2154_s15, %s15_s15  }
   0x2   : > { %p167_p1 = scmp.lt.s32.totalorder %s2115_s15, 3 }
   0x4   : > { %p168_p2 = pnand %p1999_p0, %p167_p1 }
   0x6   : > { %171 = sbr.rel (%p168_p2) target bundleno = 765 (0x2fd), region = 28 }
   0xb   : > { %p201_p3 = scmp.lt.s32.totalorder %s1995_s16, 1  ;;  %vm407_vm0 = vcmask 1042432   ;;  %vm408_vm1 = vcmask 1046532   ;;  %s2117_s21 = smov 126   ;;  %vm272_vm3 = vsmask.f32 3328 }
   0xc   : > { %vm2170_vm2 = vmor %vm407_vm0, %vm408_vm1  ;;  %vm273_vm4 = vsmask.f32 7440  ;;  %s2118_s22 = smov 127   ;;  %s2121_s23 = smov 32   ;;  %vm1706_vm6 = vcmask 130048   ;;  %vm1716_vm7 = vcmask 261120  }
   0xd   : > { %s3091_s16 = smov (!%p201_p3, %s1995_s16), 1  ;;  %vm2272_vm5 = vmor %vm272_vm3, %vm273_vm4  ;;  %s2122_s24 = smov 64   ;;  %vm1723_vm8 = vcmask 392192   ;;  %vm1730_vm9 = vcmask 523264   ;;  %vm1737_vm10 = vcmask 654336   ;;  %vm1744_vm11 = vcmask 785408  }
   0xe   : > { %s2088_s17 = smul.u32 48, %s3091_s16  ;;  %s2123_s25 = smov 96   ;;  %vm1751_vm12 = vcmask 916480   ;;  %vm1812_vm13 = vcmask 1041408   ;;  %vm1808_vm14 = vcmask 293888   ;;  %vm1870_vm15 = vcmask 7168  }
   0xf   : > { %s2124_s26 = smov 16   ;;  %s2125_s27 = smov 48  }
  0x10   : > { %s2168_s20 = scalar_lea.vmem %s3019_s0, %s2088_s17  ;;  %s2126_s28 = smov 80  }
  0x11   : > { %v2175_v1 = vld [vmem:[%s2168_s20 + $0xc] sm:$0xf]  ;;  %v2178_v2 = vld [vmem:[%s2168_s20 + $0x10] sm:$0xf]  ;;  %v2181_v3 = vld [vmem:[%s2168_s20] sm:$0xf] }
  0x12   : > { %v2006_v4 = vrot.slane %v2175_v1, 9  ;;  %v419_v5 = vrot.slane %v2178_v2, 5  ;;  %v2186_v6 = vld [vmem:[%s2168_s20 + $0x4] sm:$0xf]  ;;  %v2005_v7 = vrot.slane %v2181_v3, 9  ;;  %v309_v11 = vshll.u32 %v2178_v2, 16 }
  0x13   : > { %v412_v8 = vrot.slane %v2186_v6, 5  ;;  %v225_v9 = vld [vmem:[%s2168_s20 + $0x14] sm:$0x1]  ;;  %v2192_v10 = vld [vmem:[%s2168_s20 + $0x18] sm:$0xf]  ;;  %v313_v24 = vshrl.u32 %v2178_v2, 16 }
  0x14   : > { %v2197_v12 = vsel %vm2170_vm2, %v2006_v4, %v419_v5  ;;  %v421_v13 = vrot.slane %v419_v5, 4  ;;  %v422_v14 = vrot.slane %v225_v9, 5  ;;  %v2200_v15 = vld [vmem:[%s2168_s20 + $0x1c] sm:$0xf]  ;;  %v2007_v16 = vrot.slane %v2192_v10, 9  ;;  %s2127_s29 = smov 112  }
  0x15   : > { %458 = vrot.lane.b32.xlu1 %v2197_v12, %s2117_s21  ;;  %v2207_v17 = vsel %vm2170_vm2, %v2005_v7, %v412_v8  ;;  %v426_v18 = vrot.slane %v2200_v15, 5  ;;  %v228_v19 = vld [vmem:[%s2168_s20 + $0x20] sm:$0x1]  ;;  %v2212_v20 = vld [vmem:[%s2168_s20 + $0x24] sm:$0xf]  ;;  %v414_v32 = vrot.slane %v412_v8, 4 }
  0x16   : > { %454 = vrot.lane.b32.xlu0 %v2207_v17, %s2117_s21  ;;  %v2218_v21 = vsel %vm2170_vm2, %v421_v13, %v422_v14  ;;  %v429_v22 = vrot.slane %v228_v19, 5  ;;  %v2221_v23 = vld [vmem:[%s2168_s20 + $0x28] sm:$0xf]  ;;  %v2008_v27 = vrot.slane %v2212_v20, 9  ;;  %v231_v29 = vld [vmem:[%s2168_s20 + $0x2c] sm:$0x1] }
  0x17   : > { %v2226_v25 = vsel %vm2170_vm2, %v2007_v16, %v426_v18  ;;  %v428_v26 = vrot.slane %v426_v18, 4  ;;  %v433_v28 = vrot.slane %v2221_v23, 5  ;;  %v436_v30 = vrot.slane %v231_v29, 5  ;;  %v222_v31 = vld [vmem:[%s2168_s20 + $0x8] sm:$0x1]  ;;  %s2062_s6 = sshll.u32 %s3091_s16, 3 }
  0x18   : > { %v2232_v33 = vrot.slane %v309_v11, 5  ;;  %v415_v35 = vrot.slane %v222_v31, 5  ;;  %v315_v37 = vrot.slane %v313_v24, 4  ;;  %v319_v38 = vshll.u32 %v225_v9, 16  ;;  %s210_s9 = scalar_lea.vmem %s3021_s2, %s2062_s6  ;;  %s214_s12 = scalar_lea.vmem %s3022_s3, %s2062_s6 }
  0x19   : > { %460 = vrot.lane.b32.xlu1 %v2218_v21, %s2117_s21  ;;  %v435_v34 = vrot.slane %v433_v28, 4  ;;  %v2240_v36 = vsel %vm2170_vm2, %v428_v26, %v429_v22  ;;  %v2246_v39 = vsel %vm2170_vm2, %v2008_v27, %v433_v28  ;;  %v285_v40 = vshll.u32 %v2186_v6, 16  ;;  %s218_s16 = scalar_lea.vmem %s3023_s4, %s2062_s6 }
  0x1a   : > { %462 = vrot.lane.b32.xlu0 %v2226_v25, %s2117_s21  ;;  %v289_v41 = vshrl.u32 %v2186_v6, 16  ;;  %v2256_v43 = vsel %vm2170_vm2, %v414_v32, %v415_v35  ;;  %v316_v44 = vor.u32 %v315_v37, %v2232_v33  ;;  %v321_v45 = vrot.slane %v319_v38, 5 }
  0x1b   : > { %v2252_v42 = vsel %vm2170_vm2, %v435_v34, %v436_v30  ;;  %v2261_v46 = vrot.slane %v285_v40, 5  ;;  %v295_v48 = vshll.u32 %v222_v31, 16  ;;  %v357_v49 = vshll.u32 %v2221_v23, 16 }
  0x1c   : > { %v291_v47 = vrot.slane %v289_v41, 4  ;;  %v317_v50 = vrot.slane %v316_v44, 4  ;;  %v361_v51 = vshrl.u32 %v2221_v23, 16  ;;  %v367_v52 = vshll.u32 %v231_v29, 16 }
  0x1d   : > { %464 = vrot.lane.b32.xlu1 %v2240_v36, %s2117_s21  ;;  %v333_v53 = vshll.u32 %v2200_v15, 16  ;;  %v297_v56 = vrot.slane %v295_v48, 5  ;;  %v2277_v57 = vrot.slane %v357_v49, 5  ;;  %v337_v58 = vshrl.u32 %v2200_v15, 16 }
  0x1e   : > { %466 = vrot.lane.b32.xlu0 %v2246_v39, %s2117_s21  ;;  %v292_v55 = vor.u32 %v291_v47, %v2261_v46  ;;  %v363_v59 = vrot.slane %v361_v51, 4  ;;  %v343_v63 = vshll.u32 %v228_v19, 16  ;;  %v2292_v0 = vsel %vm2272_vm5, %v317_v50, %v321_v45 }
  0x1f   : > { %v2282_v60 = vrot.slane %v333_v53, 5  ;;  %v339_v62 = vrot.slane %v337_v58, 4  ;;  %v369_v5 = vrot.slane %v367_v52, 5  ;;  %v695_v16 = vshrl.u32 %v2218_v21, 16 }
  0x20   : > { %v293_v61 = vrot.slane %v292_v55, 4  ;;  %v364_v4 = vor.u32 %v363_v59, %v2277_v57  ;;  %v345_v9 = vrot.slane %v343_v63, 5  ;;  %v694_v18 = vshrl.u32 %v2256_v43, 16 }
  0x21   : > { %468 = vrot.lane.b32.xlu1 %v2252_v42, %s2117_s21  ;;  %v340_v8 = vor.u32 %v339_v62, %v2282_v60  ;;  %v300_v22 = vshrl.u32 %v2175_v1, 16  ;;  %v303_v26 = vshll.u32 %v2175_v1, 16  ;;  %v276_v27 = vshrl.u32 %v2181_v3, 16 }
  0x22   : > { %456 = vrot.lane.b32.xlu0 %v2256_v43, %s2117_s21  ;;  %v2297_v7 = vsel %vm2272_vm5, %v293_v61, %v297_v56  ;;  %v365_v11 = vrot.slane %v364_v4, 4  ;;  %v702_v29 = vshrl.u32 %v2240_v36, 16  ;;  %v703_v30 = vshrl.u32 %v2252_v42, 16 }
  0x23   : > { %v341_v13 = vrot.slane %v340_v8, 4  ;;  %v279_v31 = vshll.u32 %v2181_v3, 16  ;;  %v2326_v32 = vpack.i.b16 %v695_v16, %v694_v18  ;;  %v302_v34 = vrot.slane %v300_v22, 4 }
  0x24   : > { %v2306_v14 = vsel %vm2272_vm5, %v365_v11, %v369_v5  ;;  %v305_v35 = vrot.slane %v303_v26, 5  ;;  %v278_v37 = vrot.slane %v276_v27, 4  ;;  %v348_v38 = vshrl.u32 %v2212_v20, 16 }
  0x25   : > { %377 = vrot.lane.b32.xlu1 %v2292_v0, %s2118_s22  ;;  %v2312_v19 = vsel %vm2272_vm5, %v341_v13, %v345_v9  ;;  %v351_v40 = vshll.u32 %v2212_v20, 16  ;;  %v281_v45 = vrot.slane %v279_v31, 5  ;;  %v324_v47 = vshrl.u32 %v2192_v10, 16 }
  0x26   : > { %373 = vrot.lane.b32.xlu0 %v2297_v7, %s2118_s22  ;;  %v327_v48 = vshll.u32 %v2192_v10, 16  ;;  %v2342_v49 = vpack.i.b16 %v703_v30, %v702_v29  ;;  %v306_v50 = vor.u32 %v305_v35, %v302_v34  ;;  %v350_v52 = vrot.slane %v348_v38, 4 }
  0x27   : > { %v353_v53 = vrot.slane %v351_v40, 5  ;;  %v282_v55 = vor.u32 %v281_v45, %v278_v37  ;;  %v326_v56 = vrot.slane %v324_v47, 4  ;;  %v562_v16 = vshrl.u32 %v2207_v17, 16 }
  0x28   : > { %v329_v59 = vrot.slane %v327_v48, 5  ;;  %v307_v61 = vrot.slane %v306_v50, 4  ;;  %v571_v26 = vshrl.u32 %v2246_v39, 16  ;;  %v2412_v30 = vpack.i.b16 %v313_v24, %v289_v41 }
  0x29   : > { %385 = vrot.lane.b32.xlu1 %v2306_v14, %s2118_s22  ;;  %v354_v62 = vor.u32 %v353_v53, %v350_v52  ;;  %v283_v63 = vrot.slane %v282_v55, 4  ;;  %v647_v31 = vshrl.u32 %v2292_v0, 16  ;;  %v646_v34 = vshrl.u32 %v2297_v7, 16 }
  0x2a   : > { %381 = vrot.lane.b32.xlu0 %v2312_v19, %s2118_s22  ;;  %v330_v4 = vor.u32 %v329_v59, %v326_v56  ;;  %v2363_v5 = vsel %vm2272_vm5, %v307_v61, %v2232_v33  ;;  %v563_v33 = vshrl.u32 %v2197_v12, 16  ;;  %v2424_v35 = vpack.i.b16 %v361_v51, %v337_v58 }
  0x2b   : > { %v355_v8 = vrot.slane %v354_v62, 4  ;;  %v2368_v9 = vsel %vm2272_vm5, %v283_v63, %v2261_v46  ;;  %v655_v41 = vshrl.u32 %v2306_v14, 16  ;;  %v654_v37 = vshrl.u32 %v2312_v19, 16 }
  0x2c   : > { %v331_v11 = vrot.slane %v330_v4, 4  ;;  %v2394_v29 = vpack.i.b16 %v563_v33, %v562_v16  ;;  %v2434_v40 = vpack.i.b16 %v647_v31, %v646_v34  ;;  %v2452_v45 = vpack.i.b16 %v300_v22, %v276_v27 }
  0x2d   : > { %393 = vrot.lane.b32.xlu1 %v2292_v0, %s2117_s21  ;;  %v2377_v13 = vsel %vm2272_vm5, %v355_v8, %v2277_v57  ;;  %v570_v57 = vshrl.u32 %v2226_v25, 16  ;;  %v2442_v58 = vpack.i.b16 %v655_v41, %v654_v37  ;;  %v515_v48 = vshrl.u32 %v2363_v5, 16 }
  0x2e   : > { %389 = vrot.lane.b32.xlu0 %v2297_v7, %s2117_s21  ;;  %3044 = vst [vmem:[#allocation2_spill] sm:$0xff] %v2377_v13  ;;  %v2384_v46 = vsel %vm2272_vm5, %v331_v11, %v2282_v60  ;;  %v514_v50 = vshrl.u32 %v2368_v9, 16  ;;  %v2464_v52 = vpack.i.b16 %v348_v38, %v324_v47  ;;  %v523_v27 = vshrl.u32 %v2377_v13, 16 }
  0x2f   : > { %3045 = vst [vmem:[#allocation3_spill] sm:$0xff] %v2384_v46  ;;  %v2402_v60 = vpack.i.b16 %v571_v26, %v570_v57  ;;  %v522_v53 = vshrl.u32 %v2384_v46, 16  ;;  %v2119_v59 = vmov 1983009808   ;;  %v738_v62 = vlaneseq }
  0x30   : > { %v2474_v55 = vpack.i.b16 %v515_v48, %v514_v50  ;;  %v736_v61 = vunpack.c.l.s4 %v2119_v59  ;;  %v2120_v26 = vmov 1934713408  }
  0x31   : > { %401 = vrot.lane.b32.xlu1 %v2306_v14, %s2117_s21  ;;  %v2482_v47 = vpack.i.b16 %v523_v27, %v522_v53  ;;  %v739_v33 = vshrl.u32 %v738_v62, 7  ;;  %v753_v31 = vunpack.c.l.s4 %v2120_v26 }
  0x32   : > { %397 = vrot.lane.b32.xlu0 %v2312_v19, %s2117_s21  ;;  %v737_v11 = vunpack.c.0.s8 %v736_v61 }
  0x33   : > { %3046 = vst [vmem:[#allocation4_spill] sm:$0xff] %v2482_v47  ;;  %v754_v50 = vunpack.c.0.s8 %v753_v31  ;;  %v3054_v47 = vpack.i.b16 %v2218_v21, %v2256_v43 }
  0x34   : > { %v2496_v41 = vsub.s32 %v737_v11, %v739_v33 }
  0x35   : > { %444 = vrot.lane.b32.xlu1 %v2218_v21, %s2118_s22 }
  0x36   : > { %440 = vrot.lane.b32.xlu0 %v2256_v43, %s2118_s22 }
  0x39   : > { %452 = vrot.lane.b32.xlu1 %v2252_v42, %s2118_s22 }
  0x3a   : > { %448 = vrot.lane.b32.xlu0 %v2240_v36, %s2118_s22 }
  0x3d   : > { %375 = vrot.lane.b32.xlu1 %v2363_v5, %s2118_s22 }
  0x3e   : > { %371 = vrot.lane.b32.xlu0 %v2368_v9, %s2118_s22 }
  0x41   : > { %383 = vrot.lane.b32.xlu1 %v2377_v13, %s2118_s22 }
  0x42   : > { %379 = vrot.lane.b32.xlu0 %v2384_v46, %s2118_s22 }
  0x45   : > { %391 = vrot.lane.b32.xlu1 %v2363_v5, %s2117_s21 }
  0x46   : > { %387 = vrot.lane.b32.xlu0 %v2368_v9, %s2117_s21 }
  0x49   : > { %399 = vrot.lane.b32.xlu1 %v2377_v13, %s2117_s21 }
  0x4a   : > { %395 = vrot.lane.b32.xlu0 %v2384_v46, %s2117_s21 }
  0x4d   : > { %442 = vrot.lane.b32.xlu1 %v2197_v12, %s2118_s22 }
  0x4e   : > { %438 = vrot.lane.b32.xlu0 %v2207_v17, %s2118_s22 }
  0x51   : > { %450 = vrot.lane.b32.xlu1 %v2246_v39, %s2118_s22 }
  0x52   : > { %446 = vrot.lane.b32.xlu0 %v2226_v25, %s2118_s22 }
  0x55   : > { %246 = vrot.lane.b32.xlu1 %v2178_v2, %s2118_s22 }
  0x56   : > { %242 = vrot.lane.b32.xlu0 %v2186_v6, %s2118_s22 }
  0x59   : > { %254 = vrot.lane.b32.xlu1 %v2221_v23, %s2118_s22 }
  0x5a   : > { %250 = vrot.lane.b32.xlu0 %v2200_v15, %s2118_s22 }
  0x5d   : > { %262 = vrot.lane.b32.xlu1 %v2178_v2, %s2117_s21 }
  0x5e   : > { %258 = vrot.lane.b32.xlu0 %v2186_v6, %s2117_s21 }
  0x61   : > { %270 = vrot.lane.b32.xlu1 %v2221_v23, %s2117_s21 }
  0x62   : > { %266 = vrot.lane.b32.xlu0 %v2200_v15, %s2117_s21 }
  0x65   : > { %244 = vrot.lane.b32.xlu1 %v2175_v1, %s2118_s22 }
  0x66   : > { %240 = vrot.lane.b32.xlu0 %v2181_v3, %s2118_s22 }
  0x69   : > { %252 = vrot.lane.b32.xlu1 %v2212_v20, %s2118_s22 }
  0x6a   : > { %248 = vrot.lane.b32.xlu0 %v2192_v10, %s2118_s22 }
  0x6d   : > { %260 = vrot.lane.b32.xlu1 %v2175_v1, %s2117_s21 }
  0x6e   : > { %256 = vrot.lane.b32.xlu0 %v2181_v3, %s2117_s21 }
  0x71   : > { %268 = vrot.lane.b32.xlu1 %v2212_v20, %s2117_s21 }
  0x72   : > { %264 = vrot.lane.b32.xlu0 %v2192_v10, %s2117_s21 }
  0x87   : > { %v459_v56 = vpop.permute.xlu1 %458 }
  0x88   : > { %v594_v63 = vshrl.u32 %v459_v56, 16  ;;  %v455_v4 = vpop.permute.xlu0 %454 }
  0x89   : > { %v593_v8 = vshrl.u32 %v455_v4, 16  ;;  %v592_v37 = vpack.i.b16 %v459_v56, %v455_v4 }
  0x8b   : > { %v595_v16 = vpack.i.b16 %v594_v63, %v593_v8  ;;  %v461_v57 = vpop.permute.xlu1 %460  ;;  %v1013_v22 = vrot.slane %v592_v37, %v2496_v41  ;;  %v2500_v63 = vsub.s32 %v754_v50, %v739_v33 }
  0x8c   : > { %v463_v34 = vpop.permute.xlu0 %462  ;;  %v726_v8 = vshrl.u32 %v461_v57, 16 }
  0x8d   : > { %v599_v53 = vshrl.u32 %v463_v34, 16  ;;  %v2503_v56 = vrot.slane %v595_v16, %v2496_v41 }
  0x8f   : > { %v465_v48 = vpop.permute.xlu1 %464  ;;  %3047 = vst [vmem:[#allocation5_spill] sm:$0xff] %v2503_v56 }
  0x90   : > { %v467_v27 = vpop.permute.xlu0 %466  ;;  %v731_v26 = vshrl.u32 %v465_v48, 16 }
  0x91   : > { %v598_v38 = vpack.i.b16 %v467_v27, %v463_v34  ;;  %v600_v59 = vshrl.u32 %v467_v27, 16 }
  0x93   : > { %v601_v51 = vpack.i.b16 %v600_v59, %v599_v53  ;;  %v1021_v61 = vrot.slane %v598_v38, %v2496_v41  ;;  %v469_v62 = vpop.permute.xlu1 %468 }
  0x94   : > { %v730_v24 = vpack.i.b16 %v469_v62, %v465_v48  ;;  %v732_v11 = vshrl.u32 %v469_v62, 16  ;;  %v457_v54 = vpop.permute.xlu0 %456 }
  0x95   : > { %v1022_v4 = vcombine.low %v1013_v22, %v1021_v61  ;;  %v2506_v31 = vrot.slane %v601_v51, %v2496_v41  ;;  %v724_v34 = vpack.i.b16 %v461_v57, %v457_v54  ;;  %v1023_v37 = vcombine.high %v1013_v22, %v1021_v61 }
  0x96   : > { %v733_v27 = vpack.i.b16 %v732_v11, %v731_v26  ;;  %v1361_v38 = vrot.slane %v730_v24, %v2496_v41  ;;  %v725_v53 = vshrl.u32 %v457_v54, 16 }
  0x97   : > { %3048 = vst [vmem:[#allocation6_spill] sm:$0xff] %v2506_v31  ;;  %v1353_v50 = vrot.slane %v724_v34, %v2496_v41  ;;  %v2514_v16 = vpop.permute.xlu1 %377  ;;  %v2517_v59 = vrot.slane %v1022_v4, %v2500_v63  ;;  %v1037_v26 = vrot.slane %v1023_v37, %v2500_v63 }
  0x98   : > { %v2520_v51 = vrot.slane %v733_v27, %v2496_v41  ;;  %v727_v22 = vpack.i.b16 %v726_v8, %v725_v53  ;;  %v2522_v57 = vpop.permute.xlu0 %373 }
  0x99   : > { %3049 = vst [vmem:[#allocation7_spill] sm:$0xff] %v2517_v59  ;;  %v1362_v54 = vcombine.low %v1353_v50, %v1361_v38  ;;  %v1363_v24 = vcombine.high %v1353_v50, %v1361_v38  ;;  %v2065_v62 = vcombine.high %v2517_v59, %v2517_v59  ;;  %v2023_v53 = vcombine.low %v1037_v26, %v1037_v26 }
  0x9a   : > { %3050 = vst [vmem:[#allocation8_spill] sm:$0xff] %v2520_v51  ;;  %v2525_v61 = vrot.slane %v727_v22, %v2496_v41  ;;  %v2071_v8 = vcombine.high %v1037_v26, %v1037_v26 }
  0x9b   : > { %v2530_v11 = vpop.permute.xlu1 %385  ;;  %v2533_v4 = vrot.slane %v1362_v54, %v2500_v63  ;;  %1463 = vrot.lane.b32.xlu0 %v2065_v62, %s2121_s23  ;;  %v2545_v37 = vrot.slane %v1363_v24, %v2500_v63 }
  0x9c   : > { %3051 = vst [vmem:[#allocation9_spill] sm:$0xff] %v2525_v61  ;;  %v2538_v34 = vpop.permute.xlu0 %381  ;;  %v1396_v27 = vcombine.low %v2525_v61, %v2520_v51 }
  0x9d   : > { %3052 = vst [vmem:[#allocation10_spill] sm:$0xff] %v2533_v4  ;;  %v2077_v38 = vcombine.high %v2533_v4, %v2533_v4  ;;  %3053 = vst [vmem:[#allocation11_spill] sm:$0xff] %v2545_v37  ;;  %v2047_v54 = vcombine.low %v2545_v37, %v2545_v37  ;;  %v668_v33 = vpack.i.b16 %v2530_v11, %v2538_v34 }
  0x9e   : > { %v1404_v62 = vrot.slane %v1396_v27, %v2500_v63 }
  0x9f   : > { %1609 = vrot.lane.b32.xlu1 %v2077_v38, %s2121_s23  ;;  %v2548_v50 = vpop.permute.xlu1 %393  ;;  %1501 = vrot.lane.b32.xlu0 %v2023_v53, %s2122_s24 }
  0xa0   : > { %v2551_v22 = vpop.permute.xlu0 %389  ;;  %v2038_v48 = vcombine.low %v1404_v62, %v1404_v62  ;;  %v2080_v59 = vcombine.high %v1404_v62, %v1404_v62 }
  0xa1   : > { %v676_v27 = vpack.i.b16 %v2548_v50, %v2551_v22 }
  0xa3   : > { %1647 = vrot.lane.b32.xlu1 %v2047_v54, %s2122_s24  ;;  %v2557_v24 = vpop.permute.xlu1 %401  ;;  %1539 = vrot.lane.b32.xlu0 %v2071_v8, %s2123_s25  ;;  %v660_v54 = vpack.i.b16 %v2514_v16, %v2522_v57 }
  0xa4   : > { %v2560_v38 = vpop.permute.xlu0 %397 }
  0xa5   : > { %v684_v53 = vpack.i.b16 %v2557_v24, %v2560_v38  ;;  %v1210_v51 = vcombine.low %v660_v54, %v676_v27  ;;  %v671_v54 = vshrl.u32 %v2530_v11, 16 }
  0xa7   : > { %1590 = vrot.lane.b32.xlu1 %v2038_v48, %s2124_s26  ;;  %v445_v26 = vpop.permute.xlu1 %444  ;;  %v1218_v44 = vcombine.low %v668_v33, %v684_v53 }
  0xa8   : > { %v711_v8 = vshrl.u32 %v445_v26, 16  ;;  %v441_v18 = vpop.permute.xlu0 %440 }
  0xa9   : > { %v708_v28 = vpack.i.b16 %v445_v26, %v441_v18  ;;  %v710_v4 = vshrl.u32 %v441_v18, 16  ;;  %v2573_v48 = vrot.slane %v1218_v44, %v2496_v41  ;;  %v2579_v18 = vrot.slane %v1210_v51, %v2496_v41 }
  0xab   : > { %v712_v61 = vpack.i.b16 %v711_v8, %v710_v4  ;;  %1628 = vrot.lane.b32.xlu1 %v2080_v59, %s2125_s27  ;;  %v453_v37 = vpop.permute.xlu1 %452  ;;  %v1278_v46 = vcombine.low %v3054_v47, %v708_v28  ;;  %3055 = vst [vmem:[#allocation12_spill] sm:$0xff] %v2579_v18  ;;  %v3056_v59 = vpack.i.b16 %v2252_v42, %v2240_v36  ;;  %v670_v42 = vshrl.u32 %v2538_v34, 16 }
  0xac   : > { %v719_v31 = vshrl.u32 %v453_v37, 16  ;;  %v449_v56 = vpop.permute.xlu0 %448  ;;  %v1226_v21 = vcombine.low %v2579_v18, %v2573_v48 }
  0xad   : > { %v716_v13 = vpack.i.b16 %v453_v37, %v449_v56  ;;  %v718_v33 = vshrl.u32 %v449_v56, 16  ;;  %v1312_v4 = vcombine.low %v2326_v32, %v712_v61  ;;  %v2592_v43 = vrot.slane %v1278_v46, %v2496_v41 }
  0xaf   : > { %v720_v62 = vpack.i.b16 %v719_v31, %v718_v33  ;;  %v1286_v53 = vcombine.low %v3056_v59, %v716_v13  ;;  %v2585_v27 = vpop.permute.xlu1 %375  ;;  %3057 = vst [vmem:[#allocation13_spill] sm:$0xff] %v2592_v43  ;;  %v2599_v47 = vrot.slane %v1312_v4, %v2496_v41  ;;  %v2613_v31 = vrot.slane %v1226_v21, %v2500_v63 }
  0xb0   : > { %v2587_v44 = vpop.permute.xlu0 %371  ;;  %v679_v33 = vshrl.u32 %v2548_v50, 16  ;;  %v678_v4 = vshrl.u32 %v2551_v22, 16  ;;  %v686_v59 = vshrl.u32 %v2560_v38, 16  ;;  %v663_v21 = vshrl.u32 %v2514_v16, 16 }
  0xb1   : > { %v2595_v28 = vrot.slane %v1286_v53, %v2496_v41  ;;  %v1320_v32 = vcombine.low %v2342_v49, %v720_v62  ;;  %3059 = vst [vmem:[#allocation15_spill] sm:$0xff] %v2613_v31  ;;  %v687_v62 = vshrl.u32 %v2557_v24, 16 }
  0xb3   : > { %3058 = vst [vmem:[#allocation14_spill] sm:$0xff] %v2595_v28  ;;  %v1294_v36 = vcombine.low %v2592_v43, %v2595_v28  ;;  %v2606_v13 = vrot.slane %v1320_v32, %v2496_v41  ;;  %v2608_v56 = vpop.permute.xlu1 %383  ;;  %v662_v32 = vshrl.u32 %v2522_v57, 16  ;;  %v688_v24 = vpack.i.b16 %v687_v62, %v686_v59 }
  0xb4   : > { %v2610_v46 = vpop.permute.xlu0 %379  ;;  %v528_v57 = vpack.i.b16 %v2585_v27, %v2587_v44  ;;  %v606_v28 = vpack.i.b16 %v2221_v23, %v2200_v15  ;;  %v470_v62 = vpack.i.b16 %v2175_v1, %v2181_v3  ;;  %v474_v59 = vpack.i.b16 %v2212_v20, %v2192_v10 }
  0xb5   : > { %v2616_v49 = vrot.slane %v1294_v36, %v2500_v63  ;;  %v536_v50 = vpack.i.b16 %v2608_v56, %v2610_v46  ;;  %v664_v51 = vpack.i.b16 %v663_v21, %v662_v32  ;;  %v531_v32 = vshrl.u32 %v2585_v27, 16 }
  0xb6   : > { %v538_v27 = vshrl.u32 %v2610_v46, 16  ;;  %v3063_v15 = vpack.i.b16 %v2178_v2, %v2186_v6 }
  0xb7   : > { %3060 = vst [vmem:[#allocation16_spill] sm:$0xff] %v2616_v49  ;;  %v2622_v37 = vpop.permute.xlu1 %391  ;;  %v2076_v26 = vcombine.high %v2613_v31, %v2616_v49  ;;  %v672_v31 = vpack.i.b16 %v671_v54, %v670_v42 }
  0xb8   : > { %v2628_v8 = vpop.permute.xlu0 %387 }
  0xb9   : > { %1607 = vrot.lane.b32.xlu1 %v2076_v26, %s2121_s23  ;;  %v680_v26 = vpack.i.b16 %v679_v33, %v678_v4  ;;  %v544_v22 = vpack.i.b16 %v2622_v37, %v2628_v8  ;;  %v1252_v21 = vcombine.low %v672_v31, %v688_v24 }
  0xbb   : > { %v400_v53 = vpop.permute.xlu1 %399  ;;  %v1244_v43 = vcombine.low %v664_v51, %v680_v26  ;;  %v870_v18 = vcombine.low %v528_v57, %v544_v22  ;;  %v3061_v51 = vpack.i.b16 %v2197_v12, %v2207_v17  ;;  %v530_v57 = vshrl.u32 %v2587_v44, 16 }
  0xbc   : > { %v396_v36 = vpop.permute.xlu0 %395  ;;  %v3062_v44 = vpack.i.b16 %v2246_v39, %v2226_v25 }
  0xbd   : > { %v552_v61 = vpack.i.b16 %v400_v53, %v396_v36  ;;  %v532_v25 = vpack.i.b16 %v531_v32, %v530_v57 }
  0xbf   : > { %v443_v38 = vpop.permute.xlu1 %442  ;;  %v878_v11 = vcombine.low %v536_v50, %v552_v61  ;;  %v555_v61 = vshrl.u32 %v400_v53, 16  ;;  %v554_v50 = vshrl.u32 %v396_v36, 16  ;;  %v547_v53 = vshrl.u32 %v2622_v37, 16 }
  0xc0   : > { %v579_v49 = vshrl.u32 %v443_v38, 16  ;;  %v439_v34 = vpop.permute.xlu0 %438  ;;  %v546_v36 = vshrl.u32 %v2628_v8, 16 }
  0xc1   : > { %v576_v33 = vpack.i.b16 %v443_v38, %v439_v34  ;;  %v578_v4 = vshrl.u32 %v439_v34, 16  ;;  %v2655_v42 = vrot.slane %v878_v11, %v2496_v41  ;;  %v539_v34 = vshrl.u32 %v2608_v56, 16 }
  0xc2   : > { %v2667_v11 = vrot.slane %v1244_v43, %v2496_v41  ;;  %v556_v12 = vpack.i.b16 %v555_v61, %v554_v50  ;;  %v2678_v50 = vrot.slane %v1252_v21, %v2496_v41 }
  0xc3   : > { %v451_v16 = vpop.permute.xlu1 %450  ;;  %v580_v54 = vpack.i.b16 %v579_v49, %v578_v4  ;;  %v938_v26 = vcombine.low %v3061_v51, %v576_v33  ;;  %v877_v49 = vrot.slane %v870_v18, %v2496_v41  ;;  %v540_v39 = vpack.i.b16 %v539_v34, %v538_v27 }
  0xc4   : > { %v587_v22 = vshrl.u32 %v451_v16, 16  ;;  %v447_v38 = vpop.permute.xlu0 %446  ;;  %v1260_v27 = vcombine.low %v2667_v11, %v2678_v50 }
  0xc5   : > { %v584_v31 = vpack.i.b16 %v451_v16, %v447_v38  ;;  %v586_v24 = vshrl.u32 %v447_v38, 16  ;;  %v886_v16 = vcombine.low %v877_v49, %v2655_v42  ;;  %v945_v46 = vrot.slane %v938_v26, %v2496_v41 }
  0xc6   : > { %v972_v37 = vcombine.low %v2394_v29, %v580_v54 }
  0xc7   : > { %v588_v17 = vpack.i.b16 %v587_v22, %v586_v24  ;;  %v946_v33 = vcombine.low %v3062_v44, %v584_v31  ;;  %v247_v56 = vpop.permute.xlu1 %246  ;;  %v548_v22 = vpack.i.b16 %v547_v53, %v546_v36  ;;  %v887_v24 = vcombine.high %v877_v49, %v2655_v42 }
  0xc8   : > { %v615_v4 = vshrl.u32 %v247_v56, 16  ;;  %v243_v8 = vpop.permute.xlu0 %242  ;;  %v912_v44 = vcombine.low %v540_v39, %v556_v12  ;;  %v2688_v32 = vrot.slane %v886_v16, %v2500_v63 }
  0xc9   : > { %v953_v18 = vrot.slane %v946_v33, %v2496_v41  ;;  %v980_v43 = vcombine.low %v2402_v60, %v588_v17  ;;  %v612_v51 = vpack.i.b16 %v247_v56, %v243_v8  ;;  %v614_v61 = vshrl.u32 %v243_v8, 16 }
  0xca   : > { %v2685_v60 = vrot.slane %v972_v37, %v2496_v41  ;;  %v904_v34 = vcombine.low %v532_v25, %v548_v22  ;;  %v2706_v37 = vrot.slane %v912_v44, %v2496_v41  ;;  %v2716_v39 = vrot.slane %v887_v24, %v2500_v63 }
  0xcb   : > { %v954_v38 = vcombine.low %v945_v46, %v953_v18  ;;  %v955_v31 = vcombine.high %v945_v46, %v953_v18  ;;  %v2681_v26 = vrot.slane %v980_v43, %v2496_v41  ;;  %v616_v29 = vpack.i.b16 %v615_v4, %v614_v61  ;;  %v255_v54 = vpop.permute.xlu1 %254 }
  0xcc   : > { %v623_v17 = vshrl.u32 %v255_v54, 16  ;;  %v251_v33 = vpop.permute.xlu0 %250  ;;  %v2719_v22 = vrot.slane %v904_v34, %v2496_v41  ;;  %v1074_v23 = vcombine.low %v3063_v15, %v612_v51 }
  0xcd   : > { %v620_v21 = vpack.i.b16 %v255_v54, %v251_v33  ;;  %v622_v56 = vshrl.u32 %v251_v33, 16  ;;  %v2691_v57 = vrot.slane %v954_v38, %v2500_v63  ;;  %v988_v42 = vcombine.low %v2685_v60, %v2681_v26 }
  0xce   : > { %v989_v53 = vcombine.high %v2685_v60, %v2681_v26  ;;  %v1108_v36 = vcombine.low %v2412_v30, %v616_v29  ;;  %v2703_v46 = vrot.slane %v955_v31, %v2500_v63  ;;  %v1261_v30 = vcombine.high %v2667_v11, %v2678_v50 }
  0xcf   : > { %v624_v49 = vpack.i.b16 %v623_v17, %v622_v56  ;;  %v263_v12 = vpop.permute.xlu1 %262  ;;  %v2064_v16 = vcombine.high %v2688_v32, %v2691_v57  ;;  %v1082_v4 = vcombine.low %v606_v28, %v620_v21  ;;  %v2725_v28 = vrot.slane %v1260_v27, %v2500_v63 }
  0xd0   : > { %v631_v8 = vshrl.u32 %v263_v12, 16  ;;  %v259_v18 = vpop.permute.xlu0 %258  ;;  %v1115_v50 = vrot.slane %v1108_v36, %v2496_v41  ;;  %v2022_v54 = vcombine.low %v2716_v39, %v2703_v46  ;;  %v920_v24 = vcombine.low %v2719_v22, %v2706_v37 }
  0xd1   : > { %v1116_v43 = vcombine.low %v2424_v35, %v624_v49  ;;  %v628_v61 = vpack.i.b16 %v263_v12, %v259_v18  ;;  %v630_v25 = vshrl.u32 %v259_v18, 16  ;;  %1461 = vrot.lane.b32.xlu1 %v2064_v16, %s2121_s23  ;;  %v3064_v35 = vcombine.low %v2599_v47, %v2606_v13 }
  0xd2   : > { %v1089_v2 = vrot.slane %v1082_v4, %v2496_v41  ;;  %v2010_v44 = vcombine.low %v2688_v32, %v2691_v57  ;;  %v3065_v17 = vpack.i.b16 %v2292_v0, %v2297_v7  ;;  %v1081_v27 = vrot.slane %v1074_v23, %v2496_v41 }
  0xd3   : > { %v2731_v11 = vrot.slane %v3064_v35, %v2500_v63  ;;  %v1123_v38 = vrot.slane %v1116_v43, %v2496_v41  ;;  %v632_v31 = vpack.i.b16 %v631_v8, %v630_v25  ;;  %v271_v29 = vpop.permute.xlu1 %270  ;;  %v2749_v49 = vrot.slane %v988_v42, %v2500_v63 }
  0xd4   : > { %v639_v6 = vshrl.u32 %v271_v29, 16  ;;  %v267_v51 = vpop.permute.xlu0 %266  ;;  %v1142_v33 = vcombine.low %v628_v61, %v3065_v17  ;;  %v3066_v4 = vpack.i.b16 %v2306_v14, %v2312_v19  ;;  %v2757_v18 = vrot.slane %v1261_v30, %v2500_v63 }
  0xd5   : > { %v636_v21 = vpack.i.b16 %v271_v29, %v267_v51  ;;  %v638_v56 = vshrl.u32 %v267_v51, 16  ;;  %1499 = vrot.lane.b32.xlu1 %v2022_v54, %s2122_s24  ;;  %v1124_v34 = vcombine.low %v1115_v50, %v1123_v38  ;;  %v1176_v36 = vcombine.low %v632_v31, %v2434_v40 }
  0xd6   : > { %v1125_v12 = vcombine.high %v1115_v50, %v1123_v38  ;;  %v2037_v7 = vcombine.low %v2725_v28, %v2731_v11  ;;  %v1090_v43 = vcombine.low %v1081_v27, %v1089_v2  ;;  %v1091_v61 = vcombine.high %v1081_v27, %v1089_v2 }
  0xd7   : > { %v640_v16 = vpack.i.b16 %v639_v6, %v638_v56  ;;  %v1150_v8 = vcombine.low %v636_v21, %v3066_v4  ;;  %v245_v0 = vpop.permute.xlu1 %244  ;;  %v928_v42 = vrot.slane %v920_v24, %v2500_v63  ;;  %v1149_v15 = vrot.slane %v1142_v33, %v2496_v41 }
  0xd8   : > { %v483_v25 = vshrl.u32 %v245_v0, 16  ;;  %v241_v40 = vpop.permute.xlu0 %240  ;;  %v1183_v35 = vrot.slane %v1176_v36, %v2496_v41  ;;  %v2079_v50 = vcombine.high %v2725_v28, %v2731_v11  ;;  %v3067_v38 = vcombine.high %v2599_v47, %v2606_v13 }
  0xd9   : > { %v1157_v23 = vrot.slane %v1150_v8, %v2496_v41  ;;  %v1184_v14 = vcombine.low %v640_v16, %v2442_v58  ;;  %v482_v19 = vshrl.u32 %v241_v40, 16  ;;  %1588 = vrot.lane.b32.xlu1 %v2037_v7, %s2124_s26  ;;  %v2013_v30 = vcombine.low %v928_v42, %v2749_v49 }
  0xda   : > { %v2772_v31 = vrot.slane %v3067_v38, %v2500_v63  ;;  %v921_v17 = vcombine.high %v2719_v22, %v2706_v37  ;;  %v2778_v33 = vrot.slane %v1090_v43, %v2500_v63  ;;  %v2781_v28 = vrot.slane %v1091_v61, %v2500_v63 }
  0xdb   : > { %v1158_v29 = vcombine.low %v1149_v15, %v1157_v23  ;;  %v1159_v54 = vcombine.high %v1149_v15, %v1157_v23  ;;  %v1191_v58 = vrot.slane %v1184_v14, %v2496_v41  ;;  %v484_v2 = vpack.i.b16 %v483_v25, %v482_v19  ;;  %v253_v6 = vpop.permute.xlu1 %252 }
  0xdc   : > { %v491_v51 = vshrl.u32 %v253_v6, 16  ;;  %v249_v24 = vpop.permute.xlu0 %248  ;;  %v2785_v11 = vrot.slane %v1124_v34, %v2500_v63  ;;  %v2794_v37 = vrot.slane %v1125_v12, %v2500_v63  ;;  %v480_v36 = vpack.i.b16 %v245_v0, %v241_v40 }
  0xdd   : > { %v488_v47 = vpack.i.b16 %v253_v6, %v249_v24  ;;  %v490_v13 = vshrl.u32 %v249_v24, 16  ;;  %1442 = vrot.lane.b32.xlu1 %v2013_v30, %s2124_s26  ;;  %v1192_v21 = vcombine.low %v1183_v35, %v1191_v58  ;;  %v2788_v56 = vrot.slane %v1158_v29, %v2500_v63 }
  0xde   : > { %v2791_v27 = vrot.slane %v1159_v54, %v2500_v63  ;;  %v1193_v22 = vcombine.high %v1183_v35, %v1191_v58  ;;  %v768_v16 = vcombine.low %v2452_v45, %v484_v2  ;;  %v2067_v30 = vcombine.high %v928_v42, %v2749_v49 }
  0xdf   : > { %v492_v4 = vpack.i.b16 %v491_v51, %v490_v13  ;;  %v261_v8 = vpop.permute.xlu1 %260  ;;  %v2798_v7 = vrot.slane %v1192_v21, %v2500_v63  ;;  %v2075_v61 = vcombine.high %v2778_v33, %v2788_v56  ;;  %v742_v45 = vcombine.low %v474_v59, %v488_v47  ;;  %v3069_v13 = vld [vmem:[#allocation2_spill] sm:$0xff]  ;;  %v3070_v21 = vld [vmem:[#allocation3_spill] sm:$0xff] }
  0xe0   : > { %v499_v34 = vshrl.u32 %v261_v8, 16  ;;  %v257_v43 = vpop.permute.xlu0 %256  ;;  %v2045_v25 = vcombine.low %v2781_v28, %v2791_v27  ;;  %v2805_v12 = vrot.slane %v1193_v22, %v2500_v63  ;;  %v2081_v35 = vcombine.high %v2781_v28, %v2791_v27 }
  0xe1   : > { %v776_v0 = vcombine.low %v2464_v52, %v492_v4  ;;  %v496_v40 = vpack.i.b16 %v261_v8, %v257_v43  ;;  %v498_v15 = vshrl.u32 %v257_v43, 16  ;;  %1626 = vrot.lane.b32.xlu1 %v2079_v50, %s2125_s27  ;;  %v2036_v23 = vcombine.low %v2785_v11, %v2798_v7 }
  0xe2   : > { %v2078_v14 = vcombine.high %v2785_v11, %v2798_v7  ;;  %v2048_v19 = vcombine.low %v2794_v37, %v2805_v12  ;;  %v775_v10 = vrot.slane %v768_v16, %v2496_v41  ;;  %v734_v50 = vcombine.low %v470_v62, %v480_v36  ;;  %v3072_v36 = vld [vmem:[#allocation12_spill] sm:$0xff] }
  0xe3   : > { %v783_v20 = vrot.slane %v776_v0, %v2496_v41  ;;  %v500_v52 = vpack.i.b16 %v499_v34, %v498_v15  ;;  %v269_v59 = vpop.permute.xlu1 %268  ;;  %1586 = vrot.lane.b32.xlu0 %v2036_v23, %s2124_s26  ;;  %v2084_v54 = vcombine.high %v2794_v37, %v2805_v12  ;;  %v2033_v58 = vcombine.low %v2778_v33, %v2788_v56  ;;  %v3075_v0 = vld [vmem:[#allocation14_spill] sm:$0xff] }
  0xe4   : > { %v507_v38 = vshrl.u32 %v269_v59, 16  ;;  %v265_v29 = vpop.permute.xlu0 %264  ;;  %v3068_v2 = vpack.i.b16 %v2363_v5, %v2368_v9  ;;  %v749_v3 = vrot.slane %v742_v45, %v2496_v41  ;;  %v1003_v62 = vrot.slane %v989_v53, %v2500_v63  ;;  %v3074_v45 = vld [vmem:[#allocation13_spill] sm:$0xff] }
  0xe5   : > { %v504_v51 = vpack.i.b16 %v269_v59, %v265_v29  ;;  %v506_v49 = vshrl.u32 %v265_v29, 16  ;;  %1480 = vrot.lane.b32.xlu1 %v2067_v30, %s2125_s27  ;;  %v784_v1 = vcombine.low %v775_v10, %v783_v20  ;;  %v785_v42 = vcombine.high %v775_v10, %v783_v20 }
  0xe6   : > { %v802_v6 = vcombine.low %v496_v40, %v3068_v2  ;;  %v836_v24 = vcombine.low %v500_v52, %v2474_v55  ;;  %v3071_v5 = vpack.i.b16 %v3069_v13, %v3070_v21  ;;  %v2049_v22 = vcombine.low %v2757_v18, %v2772_v31  ;;  %v3073_v55 = vld [vmem:[#allocation4_spill] sm:$0xff] }
  0xe7   : > { %v508_v47 = vpack.i.b16 %v507_v38, %v506_v49  ;;  %v1227_v16 = vcombine.high %v3072_v36, %v2573_v48  ;;  %v741_v4 = vrot.slane %v734_v50, %v2496_v41  ;;  %v935_v8 = vrot.slane %v921_v17, %v2500_v63  ;;  %v3078_v49 = vld [vmem:[#allocation6_spill] sm:$0xff] }
  0xe8   : > { %v810_v9 = vcombine.low %v504_v51, %v3071_v5  ;;  %v809_v26 = vrot.slane %v802_v6, %v2496_v41  ;;  %v3076_v40 = vcombine.high %v3074_v45, %v3075_v0  ;;  %v843_v15 = vrot.slane %v836_v24, %v2496_v41  ;;  %v3077_v51 = vld [vmem:[#allocation5_spill] sm:$0xff] }
  0xe9   : > { %v844_v53 = vcombine.low %v508_v47, %v3073_v55  ;;  %1664 = vrot.lane.b32.xlu1 %v2049_v22, %s2126_s28  ;;  %v750_v34 = vcombine.low %v741_v4, %v749_v3  ;;  %v2025_v43 = vcombine.low %v935_v8, %v1003_v62  ;;  %v1241_v20 = vrot.slane %v1227_v16, %v2500_v63 }
  0xea   : > { %v817_v60 = vrot.slane %v810_v9, %v2496_v41  ;;  %v1309_v48 = vrot.slane %v3076_v40, %v2500_v63  ;;  %v792_v29 = vrot.slane %v784_v1, %v2500_v63  ;;  %v799_v6 = vrot.slane %v785_v42, %v2500_v63 }
  0xeb   : > { %v851_v10 = vrot.slane %v844_v53, %v2496_v41  ;;  %v2866_v38 = vrot.slane %v750_v34, %v2500_v63  ;;  %v3079_v24 = vcombine.low %v3077_v51, %v3078_v49  ;;  %v2070_v42 = vcombine.high %v2716_v39, %v2703_v46  ;;  %v3083_v34 = vld [vmem:[#allocation8_spill] sm:$0xff] }
  0xec   : > { %v818_v23 = vcombine.low %v809_v26, %v817_v60  ;;  %v819_v17 = vcombine.high %v809_v26, %v817_v60  ;;  %v2082_v50 = vcombine.high %v1241_v20, %v1309_v48  ;;  %v2085_v36 = vcombine.high %v2757_v18, %v2772_v31 }
  0xed   : > { %1518 = vrot.lane.b32.xlu1 %v2025_v43, %s2126_s28  ;;  %v852_v52 = vcombine.low %v843_v15, %v851_v10  ;;  %v853_v59 = vcombine.high %v843_v15, %v851_v10  ;;  %v1064_v47 = vrot.slane %v3079_v24, %v2500_v63  ;;  %v751_v16 = vcombine.high %v741_v4, %v749_v3  ;;  %v3081_v3 = vld [vmem:[#allocation11_spill] sm:$0xff] }
  0xee   : > { %v2863_v30 = vrot.slane %v818_v23, %v2500_v63  ;;  %v3080_v60 = vcombine.high %v3077_v51, %v3078_v49  ;;  %v2073_v46 = vcombine.high %v935_v8, %v1003_v62  ;;  %v833_v39 = vrot.slane %v819_v17, %v2500_v63  ;;  %v3082_v8 = vld [vmem:[#allocation9_spill] sm:$0xff]  ;;  %v3086_v49 = vld [vmem:[#allocation10_spill] sm:$0xff] }
  0xef   : > { %v860_v2 = vrot.slane %v852_v52, %v2500_v63  ;;  %v867_v41 = vrot.slane %v853_v59, %v2500_v63  ;;  %v2014_v22 = vcombine.low %v1064_v47, %v1064_v47  ;;  %v2068_v26 = vcombine.high %v1064_v47, %v1064_v47 }
  0xf0   : > { %v2009_v13 = vcombine.low %v2866_v38, %v2863_v30  ;;  %v1071_v55 = vrot.slane %v3080_v60, %v2500_v63  ;;  %v765_v18 = vrot.slane %v751_v16, %v2500_v63  ;;  %v2083_v4 = vcombine.high %v3081_v3, %v3081_v3 }
  0xf1   : > { %1683 = vrot.lane.b32.xlu1 %v2082_v50, %s2123_s25  ;;  %v2012_v21 = vcombine.low %v792_v29, %v860_v2  ;;  %v2024_v5 = vcombine.low %v799_v6, %v867_v41  ;;  %v2072_v9 = vcombine.high %v799_v6, %v867_v41  ;;  %v2066_v1 = vcombine.high %v792_v29, %v860_v2  ;;  %v3085_v41 = vld [vmem:[#allocation7_spill] sm:$0xff] }
  0xf2   : > { %v2026_v53 = vcombine.low %v1071_v55, %v1071_v55  ;;  %v2021_v31 = vcombine.low %v765_v18, %v833_v39  ;;  %v2074_v62 = vcombine.high %v1071_v55, %v1071_v55  ;;  %v3084_v43 = vcombine.high %v3082_v8, %v3083_v34 }
  0xf3   : > { %1440 = vrot.lane.b32.xlu0 %v2012_v21, %s2124_s26  ;;  %v2069_v0 = vcombine.high %v765_v18, %v833_v39  ;;  %v2046_v23 = vcombine.low %v1241_v20, %v1309_v48  ;;  %v2128_v48 = vmov 0   ;;  %v2011_v51 = vcombine.low %v3085_v41, %v3085_v41 }
  0xf4   : > { %v1411_v45 = vrot.slane %v3084_v43, %v2500_v63  ;;  %v2063_v63 = vcombine.high %v2866_v38, %v2863_v30  ;;  %1849 = vmatprep.mubr.bf16.mxu0 %v2128_v48  ;;  %v2035_v24 = vcombine.low %v3086_v49, %v3086_v49 }
  0xf5   : > { %1537 = vrot.lane.b32.xlu1 %v2070_v42, %s2123_s25 }
  0xf6   : > { %v2050_v40 = vcombine.low %v1411_v45, %v1411_v45  ;;  %v2086_v15 = vcombine.high %v1411_v45, %v1411_v45 }
  0xf7   : > { %1444 = vrot.lane.b32.xlu0 %v2014_v22, %s2124_s26 }
  0xf9   : > { %1702 = vrot.lane.b32.xlu1 %v2085_v36, %s2127_s29 }
  0xfb   : > { %1482 = vrot.lane.b32.xlu0 %v2068_v26, %s2125_s27 }
  0xfd   : > { %1556 = vrot.lane.b32.xlu1 %v2073_v46, %s2127_s29 }
  0xff   : > { %1520 = vrot.lane.b32.xlu0 %v2026_v53, %s2126_s28 }
 0x101   : > { %1497 = vrot.lane.b32.xlu1 %v2021_v31, %s2122_s24 }
 0x103   : > { %1685 = vrot.lane.b32.xlu0 %v2083_v4, %s2123_s25  ;;  %v3087_v4 = vld [vmem:[#allocation15_spill] sm:$0xff] }
 0x105   : > { %1516 = vrot.lane.b32.xlu1 %v2024_v5, %s2126_s28 }
 0x107   : > { %1558 = vrot.lane.b32.xlu0 %v2074_v62, %s2127_s29  ;;  %v3088_v62 = vld [vmem:[#allocation16_spill] sm:$0xff] }
 0x108   : > { %v3089_v8 = vcombine.low %v3087_v4, %v3088_v62 }
 0x109   : > { %1535 = vrot.lane.b32.xlu1 %v2069_v0, %s2123_s25 }
 0x10b   : > { %1666 = vrot.lane.b32.xlu0 %v2050_v40, %s2126_s28 }
 0x10d   : > { %1554 = vrot.lane.b32.xlu1 %v2072_v9, %s2127_s29  ;;  %v1464_v20 = vpop.permute.xlu0 %1463 }
 0x10f   : > { %1704 = vrot.lane.b32.xlu0 %v2086_v15, %s2127_s29 }
 0x111   : > { %v1502_v59 = vpop.permute.xlu0 %1501 }
 0x113   : > { %1645 = vrot.lane.b32.xlu0 %v2046_v23, %s2122_s24 }
 0x115   : > { %v1540_v50 = vpop.permute.xlu0 %1539 }
 0x117   : > { %1605 = vrot.lane.b32.xlu0 %v2075_v61, %s2121_s23  ;;  %v1610_v61 = vpop.permute.xlu1 %1609 }
 0x11b   : > { %1459 = vrot.lane.b32.xlu0 %v2063_v63, %s2121_s23  ;;  %v1648_v11 = vpop.permute.xlu1 %1647 }
 0x11f   : > { %1624 = vrot.lane.b32.xlu0 %v2078_v14, %s2125_s27  ;;  %v1591_v7 = vpop.permute.xlu1 %1590 }
 0x120   : > { %v1768_v9 = vsel %vm1706_vm6, %v2035_v24, %v1591_v7 }
 0x121   : > { %v1774_v22 = vsel %vm1716_vm7, %v1768_v9, %v1610_v61  ;;  %v1807_v9 = vld [vmem:[%s3020_s1] sm:$0xf] }
 0x123   : > { %1478 = vrot.lane.b32.xlu0 %v2066_v1, %s2125_s27 }
 0x127   : > { %1643 = vrot.lane.b32.xlu0 %v2045_v25, %s2122_s24  ;;  %v1629_v25 = vpop.permute.xlu1 %1628 }
 0x128   : > { %v1780_v16 = vsel %vm1723_vm8, %v1774_v22, %v1629_v25 }
 0x129   : > { %v1786_v46 = vsel %vm1730_vm9, %v1780_v16, %v1648_v11 }
 0x12b   : > { %1662 = vrot.lane.b32.xlu0 %v2048_v19, %s2126_s28  ;;  %v1608_v14 = vpop.permute.xlu1 %1607 }
 0x12f   : > { %1681 = vrot.lane.b32.xlu0 %v2081_v35, %s2123_s25 }
 0x133   : > { %1700 = vrot.lane.b32.xlu0 %v2084_v54, %s2127_s29 }
 0x143   : > { %v1462_v17 = vpop.permute.xlu1 %1461 }
 0x147   : > { %v1500_v10 = vpop.permute.xlu1 %1499 }
 0x14b   : > { %v1589_v52 = vpop.permute.xlu1 %1588 }
 0x14c   : > { %v1765_v34 = vsel %vm1706_vm6, %v3089_v8, %v1589_v52 }
 0x14d   : > { %v1772_v57 = vsel %vm1716_vm7, %v1765_v34, %v1608_v14 }
 0x14f   : > { %v1443_v19 = vpop.permute.xlu1 %1442 }
 0x150   : > { %v1712_v31 = vsel %vm1706_vm6, %v2010_v44, %v1443_v19 }
 0x151   : > { %v1720_v15 = vsel %vm1716_vm7, %v1712_v31, %v1462_v17 }
 0x153   : > { %v1627_v29 = vpop.permute.xlu1 %1626 }
 0x154   : > { %v1778_v23 = vsel %vm1723_vm8, %v1772_v57, %v1627_v29 }
 0x155   : > { %v2939_v2 = vpop.permute.xlu0 %1586 }
 0x157   : > { %v1481_v28 = vpop.permute.xlu1 %1480 }
 0x158   : > { %v1727_v44 = vsel %vm1723_vm8, %v1720_v15, %v1481_v28 }
 0x159   : > { %v1734_v61 = vsel %vm1730_vm9, %v1727_v44, %v1500_v10 }
 0x15b   : > { %v1665_v35 = vpop.permute.xlu1 %1664 }
 0x15f   : > { %v1519_v12 = vpop.permute.xlu1 %1518 }
 0x160   : > { %v1741_v25 = vsel %vm1737_vm10, %v1734_v61, %v1519_v12 }
 0x163   : > { %v1684_v21 = vpop.permute.xlu1 %1683 }
 0x165   : > { %v2941_v27 = vpop.permute.xlu0 %1440 }
 0x166   : > { %v1709_v28 = vsel %vm1706_vm6, %v2009_v13, %v2941_v27 }
 0x167   : > { %v1538_v26 = vpop.permute.xlu1 %1537 }
 0x169   : > { %v1445_v6 = vpop.permute.xlu0 %1444 }
 0x16a   : > { %v1715_v47 = vsel %vm1706_vm6, %v2011_v51, %v1445_v6  ;;  %v1762_v51 = vsel %vm1706_vm6, %v2033_v58, %v2939_v2 }
 0x16b   : > { %v1722_v1 = vsel %vm1716_vm7, %v1715_v47, %v1464_v20  ;;  %v1703_v43 = vpop.permute.xlu1 %1702  ;;  %v1748_v20 = vsel %vm1744_vm11, %v1741_v25, %v1538_v26 }
 0x16d   : > { %v1483_v37 = vpop.permute.xlu0 %1482 }
 0x16e   : > { %v1729_v42 = vsel %vm1723_vm8, %v1722_v1, %v1483_v37 }
 0x16f   : > { %v1736_v60 = vsel %vm1730_vm9, %v1729_v42, %v1502_v59  ;;  %v1557_v11 = vpop.permute.xlu1 %1556 }
 0x170   : > { %v1756_v59 = vsel %vm1751_vm12, %v1748_v20, %v1557_v11 }
 0x171   : > { %v1521_v54 = vpop.permute.xlu0 %1520 }
 0x172   : > { %v1743_v55 = vsel %vm1737_vm10, %v1736_v60, %v1521_v54 }
 0x173   : > { %v1750_v18 = vsel %vm1744_vm11, %v1743_v55, %v1540_v50  ;;  %v1498_v29 = vpop.permute.xlu1 %1497 }
 0x175   : > { %v1686_v5 = vpop.permute.xlu0 %1685 }
 0x177   : > { %v1517_v6 = vpop.permute.xlu1 %1516 }
 0x179   : > { %v1559_v36 = vpop.permute.xlu0 %1558 }
 0x17a   : > { %v1759_v3 = vsel %vm1751_vm12, %v1750_v18, %v1559_v36 }
 0x17b   : > { %v1813_v32 = vsel %vm1812_vm13, %v1759_v3, 0  ;;  %v1536_v49 = vpop.permute.xlu1 %1535 }
 0x17d   : > { %v1667_v39 = vpop.permute.xlu0 %1666 }
 0x17e   : > { %v1792_v53 = vsel %vm1737_vm10, %v1786_v46, %v1667_v39 }
 0x17f   : > { %v1798_v0 = vsel %vm1744_vm11, %v1792_v53, %v1686_v5  ;;  %v1555_v56 = vpop.permute.xlu1 %1554 }
 0x181   : > { %v1705_v45 = vpop.permute.xlu0 %1704 }
 0x182   : > { %v1806_v40 = vsel %vm1751_vm12, %v1798_v0, %v1705_v45 }
 0x183   : > { %2057 = vmatprep.subr.msk.bf16.mxu0 %vm1812_vm13, %v1806_v40 }
 0x184   : > { %1828 = vmatpush1.bf16.msra.mxu0 %v1813_v32 }
 0x185   : > { %v1646_v63 = vpop.permute.xlu0 %1645 }
 0x186   : > { %v1784_v48 = vsel %vm1730_vm9, %v1778_v23, %v1646_v63 }
 0x187   : > { %v1790_v7 = vsel %vm1737_vm10, %v1784_v48, %v1665_v35 }
 0x188   : > { %v1796_v17 = vsel %vm1744_vm11, %v1790_v7, %v1684_v21 }
 0x189   : > { %v1606_v14 = vpop.permute.xlu0 %1605  ;;  %v1803_v52 = vsel %vm1751_vm12, %v1796_v17, %v1703_v43 }
 0x18a   : > { %1829 = vmatprep.subr.bf16.mxu0 %v1803_v52  ;;  %v1770_v30 = vsel %vm1716_vm7, %v1762_v51, %v1606_v14 }
 0x18b   : > { %1830 = vmatpush1.bf16.msra.mxu0 %v1756_v59 }
 0x18d   : > { %v1460_v19 = vpop.permute.xlu0 %1459 }
 0x18e   : > { %v1718_v37 = vsel %vm1716_vm7, %v1709_v28, %v1460_v19 }
 0x191   : > { %v1625_v50 = vpop.permute.xlu0 %1624 }
 0x192   : > { %v1776_v27 = vsel %vm1723_vm8, %v1770_v30, %v1625_v50 }
 0x195   : > { %v1479_v10 = vpop.permute.xlu0 %1478 }
 0x196   : > { %v1725_v12 = vsel %vm1723_vm8, %v1718_v37, %v1479_v10 }
 0x197   : > { %v1732_v41 = vsel %vm1730_vm9, %v1725_v12, %v1498_v29 }
 0x198   : > { %v1739_v13 = vsel %vm1737_vm10, %v1732_v41, %v1517_v6 }
 0x199   : > { %v1644_v35 = vpop.permute.xlu0 %1643  ;;  %v1746_v21 = vsel %vm1744_vm11, %v1739_v13, %v1536_v49 }
 0x19a   : > { %v1782_v24 = vsel %vm1730_vm9, %v1776_v27, %v1644_v35  ;;  %v1753_v2 = vsel %vm1751_vm12, %v1746_v21, %v1555_v56 }
 0x19d   : > { %v1663_v54 = vpop.permute.xlu0 %1662 }
 0x19e   : > { %v1788_v47 = vsel %vm1737_vm10, %v1782_v24, %v1663_v54 }
 0x1a1   : > { %v1682_v38 = vpop.permute.xlu0 %1681 }
 0x1a2   : > { %v1794_v5 = vsel %vm1744_vm11, %v1788_v47, %v1682_v38 }
 0x1a5   : > { %v1701_v33 = vpop.permute.xlu0 %1700 }
 0x1a6   : > { %v1800_v58 = vsel %vm1751_vm12, %v1794_v5, %v1701_v33 }
 0x1a7   : > { %1831 = vmatprep.subr.bf16.mxu0 %v1800_v58 }
 0x1a8   : > { %1832 = vmatpush1.bf16.msra.mxu0 %v1753_v2 }
 0x1ab   : > { %2058 = vmatmul.mubr.msk.bf16.vlgmr.msra.gmra.mxu0 %vm1808_vm14, %v1807_v9 }
 0x26b   : > { %v1851_v1 = vpop.f32.mrf.mxu0 }
 0x26c   : > { %v1872_v16 = vmul.f32 %v1851_v1, %v1851_v1 }
 0x26d   : > { %v1853_v42 = vpop.f32.mrf.mxu0 }
 0x26e   : > { %v2087_v22 = vpack.c.bf16 %v1853_v42, %v1851_v1  ;;  %v1867_v36 = vadd.f32 %v1853_v42, %v1851_v1  ;;  %v1873_v26 = vmul.f32 %v1853_v42, %v1853_v42 }
 0x26f   : > { %v1855_v60 = vpop.f32.mrf.mxu0 }
 0x270   : > { %1866 = vst [vmem:[%s210_s9] sm:$0xff] %v2087_v22  ;;  %1868 = vadd.xlane.f32.xlu0 %v1867_v36  ;;  %v1874_v55 = vadd.f32 %v1873_v26, %v1872_v16 }
 0x271   : > { %v1856_v46 = vpop.f32.mrf.mxu0 }
 0x272   : > { %1875 = vadd.xlane.f32.xlu1 %v1874_v55 }
 0x2f9   : > { %v1869_v39 = vpop.xlane.xlu0 %1868 }
 0x2fa   : > { %1871 = vst.msk [vmem:[%s214_s12] sm:$0xff] %vm1870_vm15, %v1869_v39 }
 0x2fb   : > { %v1876_v53 = vpop.xlane.xlu1 %1875 }
 0x2fc   : > { %1877 = vst.msk [vmem:[%s218_s16] sm:$0xff] %vm1870_vm15, %v1876_v53 }
 0x2fd PF: > { %s15_s15 = sadd.s32 1, %s2115_s15  }
 0x2fe   : > { %p12_p4 = scmp.ge.s32.totalorder %s15_s15, 4  }
 0x300   :  { %14 = sbr.rel (!%p12_p4) target bundleno = 1 (0x1), region = 82 }

</bundles_post_ra>
